<compile_context>
chip_gen: v6e
topology: v6e:2x2x1
jax: 0.10.0
libtpu: 0.0.40
codegen_flags: <defaults>
</compile_context>

<pallas_src>
import functools

import jax
import jax.numpy as jnp
from jax.experimental import pallas as pl
from jax.experimental.pallas import tpu as pltpu

_LANE = 128
_SUBLANE = 8


def _round_up(x, m):
    return ((x + m - 1) // m) * m


def _vmem_tile_bytes(rows, cols, dtype):
    """VMEM footprint of a (rows, cols) tile with (sublane,128) layout rounding."""
    isz = jnp.dtype(dtype).itemsize
    sub = _SUBLANE * max(1, 4 // isz)  # 8 rows f32, 16 rows bf16, 32 rows int8
    return (_round_up(max(int(rows), 1), sub)
            * _round_up(max(int(cols), 1), _LANE) * isz)


@functools.lru_cache(maxsize=1)
def _buffered_single_supported():
    """Whether pl.Buffered(1) single-buffering of resident operands is available."""
    try:
        pl.BlockSpec((_SUBLANE, _LANE), lambda i: (0, 0), pipeline_mode=pl.Buffered(1))
        return True
    except Exception:
        return False


@functools.lru_cache(maxsize=1)
def _tpu_hw_info():
    """(vmem_capacity_bytes, is_multi_tensorcore_chip)."""
    kind = ""
    try:
        kind = jax.devices()[0].device_kind.lower()
    except Exception:
        pass
    is_v7 = any(t in kind for t in ("v7", "tpu7", "7x"))
    vmem_cap = None
    try:
        vmem_cap = int(pltpu.get_tpu_info().vmem_capacity_bytes)
    except Exception:
        vmem_cap = None
    if not vmem_cap or vmem_cap <= 0:
        vmem_cap = (64 << 20) if is_v7 else (128 << 20)
    return vmem_cap, is_v7


# --------------------------------------------------------------------------- #
# Kernels
# --------------------------------------------------------------------------- #
def _match_kernel(x_ref, w1_ref, b1_ref, w2_ref, b2_ref, o_ref):
    # fc1 + ReLU  (MXU matmul, f32 accumulation, f32 bias/ReLU epilogue)
    h = jnp.dot(x_ref[...], w1_ref[...], preferred_element_type=jnp.float32)
    h = jnp.maximum(h + b1_ref[...], 0.0)
    # fc2 + ReLU
    y = jnp.dot(h.astype(w2_ref.dtype), w2_ref[...],
                preferred_element_type=jnp.float32)
    o_ref[...] = jnp.maximum(y + b2_ref[...], 0.0).astype(o_ref.dtype)


def _match_kernel_outtiled(x_ref, w1_ref, b1_ref, w2_ref, b2_ref, o_ref, h_ref):
    # Inner ('arbitrary') axis streams w2 / b2 / output in lane blocks.
    # fc1 activation is computed once per batch tile into the VMEM scratch.
    @pl.when(pl.program_id(1) == 0)
    def _():
        h = jnp.dot(x_ref[...], w1_ref[...], preferred_element_type=jnp.float32)
        h_ref[...] = jnp.maximum(h + b1_ref[...], 0.0)

    y = jnp.dot(h_ref[...].astype(w2_ref.dtype), w2_ref[...],
                preferred_element_type=jnp.float32)
    o_ref[...] = jnp.maximum(y + b2_ref[...], 0.0).astype(o_ref.dtype)


# --------------------------------------------------------------------------- #
# Parameter preparation (call ONCE per parameter set, reuse the result)
# --------------------------------------------------------------------------- #
def prepare_match_params(w1_t, b1, w2_t, b2, *, input_dtype=None):
    """Pad hidden/output feature dims up to multiples of 128 (lane-dense MXU N
    dims + unmasked output stores) and optionally cast weights to a bf16
    MXU-input dtype.  Zero padding is exact for relu(x @ W + b).

    bf16 inputs (input_dtype=jnp.bfloat16) are recommended on v5e, v6e and v7x:
    accumulation and the bias/ReLU epilogue stay in f32 inside the kernel.
    """
    in_dim, hid = w1_t.shape
    hid2, out_dim = w2_t.shape
    assert hid2 == hid, "w1_t is (input, hidden), w2_t is (hidden, output)"
    hid_p = _round_up(hid, _LANE)
    out_p = _round_up(out_dim, _LANE)

    b1 = jnp.reshape(b1, (1, hid)).astype(jnp.float32)
    b2 = jnp.reshape(b2, (1, out_dim)).astype(jnp.float32)
    if input_dtype is not None:
        w1_t = w1_t.astype(input_dtype)
        w2_t = w2_t.astype(input_dtype)
    if hid_p != hid:
        w1_t = jnp.pad(w1_t, ((0, 0), (0, hid_p - hid)))
        b1 = jnp.pad(b1, ((0, 0), (0, hid_p - hid)))
        w2_t = jnp.pad(w2_t, ((0, hid_p - hid), (0, 0)))
    if out_p != out_dim:
        w2_t = jnp.pad(w2_t, ((0, 0), (0, out_p - out_dim)))
        b2 = jnp.pad(b2, ((0, 0), (0, out_p - out_dim)))

    return {
        "w1_t": w1_t, "b1": b1, "w2_t": w2_t, "b2": b2,
        "in_dim": in_dim, "hid_p": hid_p, "out_dim": out_dim, "out_p": out_p,
        "input_dtype": jnp.dtype(input_dtype) if input_dtype is not None else None,
    }


# --------------------------------------------------------------------------- #
# Layout-rounded VMEM working-set estimates
# --------------------------------------------------------------------------- #
def _ws_resident(block_b, in_dim, hid_p, out_p, x_dt, w_dt, out_dt, w_buf):
    return (2 * _vmem_tile_bytes(block_b, in_dim, x_dt)             # x (double-buf)
            + w_buf * (_vmem_tile_bytes(in_dim, hid_p, w_dt)
                       + _vmem_tile_bytes(hid_p, out_p, w_dt)
                       + _vmem_tile_bytes(1, hid_p, jnp.float32)
                       + _vmem_tile_bytes(1, out_p, jnp.float32))
            + 2 * _vmem_tile_bytes(block_b, out_p, out_dt)          # out (double-buf)
            + _vmem_tile_bytes(block_b, hid_p, jnp.float32)         # h intermediate
            + _vmem_tile_bytes(block_b, out_p, jnp.float32))        # y intermediate


def _ws_outtiled(block_b, block_out, in_dim, hid_p, x_dt, w_dt, out_dt, w_buf):
    return (2 * _vmem_tile_bytes(block_b, in_dim, x_dt)
            + w_buf * (_vmem_tile_bytes(in_dim, hid_p, w_dt)
                       + _vmem_tile_bytes(1, hid_p, jnp.float32))
            + 2 * (_vmem_tile_bytes(hid_p, block_out, w_dt)
                   + _vmem_tile_bytes(1, block_out, jnp.float32))
            + 2 * _vmem_tile_bytes(block_b, block_out, out_dt)
            + _vmem_tile_bytes(block_b, hid_p, jnp.float32)          # h scratch
            + _vmem_tile_bytes(block_b, block_out, jnp.float32))


# --------------------------------------------------------------------------- #
# Forward
# --------------------------------------------------------------------------- #
def match_forward(feat, params, *, block_b=None, block_out=None, out_dtype=None):
    """feat: (B, input_size).  params: output of prepare_match_params.
    Returns (B, output_size) in `out_dtype` (defaults to the compute input dtype)."""
    B, in_dim = feat.shape
    assert in_dim == params["in_dim"]
    w1_t, b1 = params["w1_t"], params["b1"]
    w2_t, b2 = params["w2_t"], params["b2"]
    hid_p, out_p, out_dim = params["hid_p"], params["out_p"], params["out_dim"]

    if params["input_dtype"] is not None and feat.dtype != params["input_dtype"]:
        feat = feat.astype(params["input_dtype"])
    x_dt = feat.dtype
    w_dt = w1_t.dtype
    out_dtype = jnp.dtype(out_dtype) if out_dtype is not None else jnp.dtype(x_dt)

    vmem_cap, is_multi_tc = _tpu_hw_info()
    budget = int(0.55 * vmem_cap)
    w_buf = 1 if _buffered_single_supported() else 2
    sub = _SUBLANE * max(1, 4 // jnp.dtype(x_dt).itemsize)   # 8 rows f32, 16 bf16

    # ---- batch tile selection (generation-aware, layout-rounded VMEM budget) ----
    if block_b is None:
        target = 1024 if is_multi_tc else 2048    # v7x: 64 MiB VMEM; v5e/v6e: 128 MiB
        block_b = min(target, _round_up(B, sub))
        block_b = max(sub, _round_up(block_b, sub))
        while (block_b > sub
               and _ws_resident(block_b, in_dim, hid_p, out_p,
                                x_dt, w_dt, out_dtype, w_buf) > budget):
            block_b = max(sub, _round_up(block_b // 2, sub))
        # >=2 'parallel' steps only help a 2-TensorCore chip (v7x); on v5e/v6e the
        # grid is a serial loop, so keep a single tile for small batches.
        if is_multi_tc and B >= 2 * sub and pl.cdiv(B, block_b) < 2:
            block_b = max(sub, _round_up(pl.cdiv(B, 2), sub))
    block_b = max(sub, _round_up(int(block_b), sub))
    n_b = pl.cdiv(B, block_b)

    # Does the fully-resident-weights layout fit VMEM even at the smallest tile?
    need_out_tiling = (block_out is not None) or (
        _ws_resident(sub, in_dim, hid_p, out_p, x_dt, w_dt, out_dtype, w_buf) > budget)

    if not need_out_tiling:
        def _resident_spec(shape):
            idx = lambda i: (0,) * len(shape)
            if _buffered_single_supported():
                return pl.BlockSpec(shape, idx, pipeline_mode=pl.Buffered(1))
            return pl.BlockSpec(shape, idx)

        ws = _ws_resident(block_b, in_dim, hid_p, out_p, x_dt, w_dt, out_dtype, w_buf)
        vmem_limit = int(min(max(2 * ws, 8 << 20), int(0.85 * vmem_cap)))

        out = pl.pallas_call(
            _match_kernel,
            out_shape=jax.ShapeDtypeStruct((B, out_p), out_dtype),
            grid_spec=pltpu.PrefetchScalarGridSpec(
                num_scalar_prefetch=0,
                grid=(n_b,),
                in_specs=[
                    pl.BlockSpec((block_b, in_dim), lambda i: (i, 0)),  # x tile
                    _resident_spec((in_dim, hid_p)),                    # w1^T resident
                    _resident_spec((1, hid_p)),                         # b1
                    _resident_spec((hid_p, out_p)),                     # w2^T resident
                    _resident_spec((1, out_p)),                         # b2
                ],
                out_specs=pl.BlockSpec((block_b, out_p), lambda i: (i, 0)),
            ),
            compiler_params=pltpu.CompilerParams(
                dimension_semantics=("parallel",),
                vmem_limit_bytes=vmem_limit,
            ),
        )(feat, w1_t, b1, w2_t, b2)
    else:
        # v7x-style fallback: stream w2/b2/output in lane blocks over an inner
        # 'arbitrary' axis; the fc1 activation lives in VMEM scratch per batch tile.
        if block_out is None:
            block_out = min(out_p, 4 * _LANE)
            while (block_out > _LANE
                   and (out_p % block_out != 0
                        or _ws_outtiled(block_b, block_out, in_dim, hid_p,
                                        x_dt, w_dt, out_dtype, w_buf) > budget)):
                block_out -= _LANE
            block_out = max(_LANE, block_out)
        assert out_p % block_out == 0, "block_out must divide the padded output dim"
        # TODO(synk): if w1 (in_dim x hid_p) alone overflows VMEM, a further hid/K
        # tiling with an f32 accumulator would be needed; not implemented here.
        n_j = out_p // block_out

        def _resident_spec2(shape):
            idx = lambda i, j: (0,) * len(shape)
            if _buffered_single_supported():
                return pl.BlockSpec(shape, idx, pipeline_mode=pl.Buffered(1))
            return pl.BlockSpec(shape, idx)

        ws = _ws_outtiled(block_b, block_out, in_dim, hid_p, x_dt, w_dt,
                          out_dtype, w_buf)
        vmem_limit = int(min(max(2 * ws, 8 << 20), int(0.85 * vmem_cap)))

        out = pl.pallas_call(
            _match_kernel_outtiled,
            out_shape=jax.ShapeDtypeStruct((B, out_p), out_dtype),
            grid_spec=pltpu.PrefetchScalarGridSpec(
                num_scalar_prefetch=0,
                grid=(n_b, n_j),
                in_specs=[
                    pl.BlockSpec((block_b, in_dim), lambda i, j: (i, 0)),   # x tile
                    _resident_spec2((in_dim, hid_p)),                       # w1^T
                    _resident_spec2((1, hid_p)),                            # b1
                    pl.BlockSpec((hid_p, block_out), lambda i, j: (0, j)),  # w2 block
                    pl.BlockSpec((1, block_out), lambda i, j: (0, j)),      # b2 block
                ],
                out_specs=pl.BlockSpec((block_b, block_out), lambda i, j: (i, j)),
                scratch_shapes=[pltpu.VMEM((block_b, hid_p), jnp.float32)],
            ),
            compiler_params=pltpu.CompilerParams(
                dimension_semantics=("parallel", "arbitrary"),
                vmem_limit_bytes=vmem_limit,
            ),
        )(feat, w1_t, b1, w2_t, b2)

    # Only slice when the output feature dim was actually padded.
    return out if out_p == out_dim else out[:, :out_dim]


# --------------------------------------------------------------------------- #
# Init helpers + self-test
# --------------------------------------------------------------------------- #
def xavier_normal(key, fan_out, fan_in, dtype=jnp.float32):
    # torch.nn.init.xavier_normal_: std = sqrt(2 / (fan_in + fan_out)), gain=1
    std = (2.0 / (fan_in + fan_out)) ** 0.5
    return std * jax.random.normal(key, (fan_out, fan_in), dtype=dtype)


if __name__ == "__main__":
    # Module hyperparams (small, consistent with the forward pass)
    input_size, hidden_size, output_size = 32, 64, 16
    batch = 8

    key = jax.random.PRNGKey(0)
    k_x, k_w1, k_w2, k_x2, k_w3, k_w4, k_x3 = jax.random.split(key, 7)

    # Deterministic parameter init matching nn.init in the module
    w1 = xavier_normal(k_w1, hidden_size, input_size)   # (hidden, input) PyTorch layout
    b1 = jnp.zeros((hidden_size,), jnp.float32)         # constant_(bias, 0)
    w2 = xavier_normal(k_w2, output_size, hidden_size)  # (output, hidden) PyTorch layout
    b2 = jnp.zeros((output_size,), jnp.float32)

    def ref_fn(x, w_1, b_1, w_2, b_2):
        h = jnp.maximum(x @ w_1.T + b_1, 0.0)
        return jnp.maximum(h @ w_2.T + b_2, 0.0)

    # Prepare (pad/cast) parameters ONCE, reuse across calls.
    params_f32 = prepare_match_params(w1.T, b1, w2.T, b2)
    params_bf16 = prepare_match_params(w1.T, b1, w2.T, b2, input_dtype=jnp.bfloat16)

    # 1) f32 path, tiny batch (single tile)
    feat = jax.random.normal(k_x, (batch, input_size), jnp.float32)
    out = jax.block_until_ready(match_forward(feat, params_f32))
    assert out.shape == (batch, output_size)
    assert jnp.allclose(out, ref_fn(feat, w1, b1, w2, b2), atol=1e-5, rtol=1e-5)

    # 2) larger, ragged batch: exercises cdiv grid WITHOUT any feat padding copy
    feat2 = jax.random.normal(k_x2, (1037, input_size), jnp.float32)
    out2 = jax.block_until_ready(match_forward(feat2, params_f32))
    assert out2.shape == (1037, output_size)
    assert jnp.allclose(out2, ref_fn(feat2, w1, b1, w2, b2), atol=1e-5, rtol=1e-5)

    # 3) bf16 MXU-input path (recommended on v5e/v6e/v7x): bf16 in/out,
    #    f32 accumulation + f32 bias/ReLU epilogue inside the kernel.
    out3 = jax.block_until_ready(match_forward(feat2, params_bf16))
    assert out3.shape == (1037, output_size)
    assert out3.dtype == jnp.bfloat16
    assert jnp.allclose(out3.astype(jnp.float32), ref_fn(feat2, w1, b1, w2, b2),
                        atol=5e-2, rtol=5e-2)

    # 4) forced output-tiled fallback path (w2/b2 streamed over an inner
    #    'arbitrary' axis; used automatically when resident weights exceed the
    #    generation-aware VMEM budget, e.g. large hidden dims on v7x).
    hid4, out4 = 96, 200
    w3 = xavier_normal(k_w3, hid4, input_size)
    b3 = jnp.zeros((hid4,), jnp.float32)
    w4 = xavier_normal(k_w4, out4, hid4)
    b4 = jnp.zeros((out4,), jnp.float32)
    params4 = prepare_match_params(w3.T, b3, w4.T, b4)
    feat4 = jax.random.normal(k_x3, (300, input_size), jnp.float32)
    out_t = jax.block_until_ready(match_forward(feat4, params4, block_out=128))
    assert out_t.shape == (300, out4)
    assert jnp.allclose(out_t, ref_fn(feat4, w3, b3, w4, b4), atol=1e-4, rtol=1e-4)

    print("KERNEL_OK")
</pallas_src>

<mosaic_0001>
module attributes {stable_mosaic.version = 11 : i64} {
  func.func @_match_kernel(%arg0: i32, %arg1: memref<8x32xf32, #tpu.memory_space<vmem>>, %arg2: memref<32x128xf32, #tpu.memory_space<vmem>>, %arg3: memref<1x128xf32, #tpu.memory_space<vmem>>, %arg4: memref<128x128xf32, #tpu.memory_space<vmem>>, %arg5: memref<1x128xf32, #tpu.memory_space<vmem>>, %arg6: memref<8x128xf32, #tpu.memory_space<vmem>>) attributes {dimension_semantics = [#tpu.dimension_semantics<parallel>], iteration_bounds = array<i64: 1>, scalar_prefetch = 0 : i64, scratch_operands = 0 : i64, tpu.core_type = #tpu.core_type<tc>, window_params = [{transform_indices = @transform_0, window_bounds = array<i64: 8, 32>}, {pipeline_mode = #tpu.pipeline_mode<synchronous>, transform_indices = @transform_1, window_bounds = array<i64: 32, 128>}, {pipeline_mode = #tpu.pipeline_mode<synchronous>, transform_indices = @transform_2, window_bounds = array<i64: 1, 128>}, {pipeline_mode = #tpu.pipeline_mode<synchronous>, transform_indices = @transform_3, window_bounds = array<i64: 128, 128>}, {pipeline_mode = #tpu.pipeline_mode<synchronous>, transform_indices = @transform_4, window_bounds = array<i64: 1, 128>}, {transform_indices = @transform_5, window_bounds = array<i64: 8, 128>}]} {
    %c0 = arith.constant 0 : index
    %c0_0 = arith.constant 0 : index
    %0 = vector.load %arg1[%c0, %c0_0] : memref<8x32xf32, #tpu.memory_space<vmem>>, vector<8x32xf32>
    %c0_1 = arith.constant 0 : index
    %c0_2 = arith.constant 0 : index
    %1 = vector.load %arg2[%c0_1, %c0_2] : memref<32x128xf32, #tpu.memory_space<vmem>>, vector<32x128xf32>
    %cst = arith.constant dense<0.000000e+00> : vector<8x128xf32>
    %2 = tpu.matmul %0, %1, %cst {dimension_numbers = #tpu.dot_dimension_numbers<[1], [0], [0], [1], [0, 0, 1, 1], [], []>} : vector<8x32xf32>, vector<32x128xf32>, vector<8x128xf32> -> vector<8x128xf32>
    %c0_3 = arith.constant 0 : index
    %c0_4 = arith.constant 0 : index
    %3 = vector.load %arg3[%c0_3, %c0_4] : memref<1x128xf32, #tpu.memory_space<vmem>>, vector<1x128xf32>
    %4 = vector.broadcast %3 : vector<1x128xf32> to vector<8x128xf32>
    %5 = arith.addf %2, %4 : vector<8x128xf32>
    %cst_5 = arith.constant 0.000000e+00 : f32
    %6 = vector.broadcast %cst_5 : f32 to vector<8x128xf32>
    %7 = arith.maximumf %5, %6 : vector<8x128xf32>
    %c0_6 = arith.constant 0 : index
    %c0_7 = arith.constant 0 : index
    %8 = vector.load %arg4[%c0_6, %c0_7] : memref<128x128xf32, #tpu.memory_space<vmem>>, vector<128x128xf32>
    %cst_8 = arith.constant dense<0.000000e+00> : vector<8x128xf32>
    %9 = tpu.matmul %7, %8, %cst_8 {dimension_numbers = #tpu.dot_dimension_numbers<[1], [0], [0], [1], [0, 0, 1, 1], [], []>} : vector<8x128xf32>, vector<128x128xf32>, vector<8x128xf32> -> vector<8x128xf32>
    %c0_9 = arith.constant 0 : index
    %c0_10 = arith.constant 0 : index
    %10 = vector.load %arg5[%c0_9, %c0_10] : memref<1x128xf32, #tpu.memory_space<vmem>>, vector<1x128xf32>
    %11 = vector.broadcast %10 : vector<1x128xf32> to vector<8x128xf32>
    %12 = arith.addf %9, %11 : vector<8x128xf32>
    %cst_11 = arith.constant 0.000000e+00 : f32
    %13 = vector.broadcast %cst_11 : f32 to vector<8x128xf32>
    %14 = arith.maximumf %12, %13 : vector<8x128xf32>
    %c0_12 = arith.constant 0 : index
    %c0_13 = arith.constant 0 : index
    %15 = vector.load %arg6[%c0_12, %c0_13] : memref<8x128xf32, #tpu.memory_space<vmem>>, vector<8x128xf32>
    tpu.vector_store %arg6[%c0_12, %c0_13], %14 {strides = array<i32>} : memref<8x128xf32, #tpu.memory_space<vmem>>, vector<8x128xf32>,
    return
  }
  func.func @transform_0(%arg0: i32) -> (i32, i32) {
    %c0_i32 = arith.constant 0 : i32
    %c0_i32_0 = arith.constant 0 : i32
    return %arg0, %c0_i32 : i32, i32
  }
  func.func @transform_1(%arg0: i32) -> (i32, i32) {
    %c0_i32 = arith.constant 0 : i32
    %c0_i32_0 = arith.constant 0 : i32
    %c0_i32_1 = arith.constant 0 : i32
    return %c0_i32, %c0_i32_0 : i32, i32
  }
  func.func @transform_2(%arg0: i32) -> (i32, i32) {
    %c0_i32 = arith.constant 0 : i32
    %c0_i32_0 = arith.constant 0 : i32
    %c0_i32_1 = arith.constant 0 : i32
    return %c0_i32, %c0_i32_0 : i32, i32
  }
  func.func @transform_3(%arg0: i32) -> (i32, i32) {
    %c0_i32 = arith.constant 0 : i32
    %c0_i32_0 = arith.constant 0 : i32
    %c0_i32_1 = arith.constant 0 : i32
    return %c0_i32, %c0_i32_0 : i32, i32
  }
  func.func @transform_4(%arg0: i32) -> (i32, i32) {
    %c0_i32 = arith.constant 0 : i32
    %c0_i32_0 = arith.constant 0 : i32
    %c0_i32_1 = arith.constant 0 : i32
    return %c0_i32, %c0_i32_0 : i32, i32
  }
  func.func @transform_5(%arg0: i32) -> (i32, i32) {
    %c0_i32 = arith.constant 0 : i32
    %c0_i32_0 = arith.constant 0 : i32
    return %arg0, %c0_i32 : i32, i32
  }
}

</mosaic_0001>

<bundles_post_ra>
// kernel: tpu_custom_call.1
= control target key start
LH: loop header
LB: loop body
LE: loop exit
PB: predicated region body
PF: predicated region fallthrough
CT: control target
= control target key end

     0   :  { %10 = vsyncpa [#allocation3], 0  ;;  %s501_s0 = inlined_call_operand.hbm [shape: f32[8,32], index: 0, kind: input, shape index: {}]   ;;  %s502_s1 = inlined_call_operand.hbm [shape: f32[32,128], index: 1, kind: input, shape index: {}]   ;;  %s503_s2 = inlined_call_operand.vmem [shape: f32[1,128], index: 2, kind: input, shape index: {}]   ;;  %s504_s3 = inlined_call_operand.hbm [shape: f32[128,128], index: 3, kind: input, shape index: {}]   ;;  %s505_s4 = inlined_call_operand.vmem [shape: f32[1,128], index: 4, kind: input, shape index: {}]   ;;  %s506_s5 = inlined_call_operand.hbm [shape: f32[8,128], index: 5, kind: output, shape index: {}]  }
   0x1   :  { %11 = vsyncpa [#allocation6], 0 }
   0x2   :  { %12 = vsyncpa [#allocation4], 0  ;;  %s423_s18 = smov [#allocation5]  }
   0x3   :  { %s28_s19 = sshll.u32 %s423_s18, 4  ;;  %s29_s19 = int_to_ptr.vmem [resolvable:$true] %s28_s19 }
   0x4   :  { %s345_s20 = scalar_lea.vmem %s29_s19, 512  ;;  %p350_p1 = scmp.lt.s32.totalorder %s29_s19, %s29_s19 }
   0x5   :  { %p346_p0 = scmp.ne.s32.totalorder %s29_s19, %s345_s20  ;;  %p351_p2 = scmp.lt.s32.totalorder %s345_s20, %s345_s20 }
   0x7   :  { %p352_p3 = por %p351_p2, %p350_p1 }
   0x9   :  { %p353_p4 = pnand %p352_p3, %p346_p0 }
   0xb   :  { %356 = shalt.err (!%p353_p4)
}
   0xc   :  { %s424_s21 = smov 128   ;;  %s425_s22 = smov 8  }
   0xd   :  { %34 = dma.hbm_to_vmem [thread:$0]  %s502_s1, 512, %s29_s19, [#allocation6], %s424_s21, %s424_s21, %s425_s22  }
   0xe   :  { %s426_s25 = smov [#allocation2]   ;;  %s427_s27 = smov [#allocation7]  }
   0xf   :  { %s19_s26 = sshll.u32 %s426_s25, 4  ;;  %s42_s28 = sshll.u32 %s427_s27, 4  ;;  %s20_s26 = int_to_ptr.vmem [resolvable:$true] %s19_s26  ;;  %s43_s28 = int_to_ptr.vmem [resolvable:$true] %s42_s28 }
  0x10   :  { %s365_s29 = scalar_lea.vmem %s20_s26, 128  ;;  %p370_p6 = scmp.lt.s32.totalorder %s20_s26, %s20_s26 }
  0x11   :  { %p366_p5 = scmp.ne.s32.totalorder %s20_s26, %s365_s29  ;;  %p371_p7 = scmp.lt.s32.totalorder %s365_s29, %s365_s29 }
  0x13   :  { %p372_p8 = por %p371_p7, %p370_p6 }
  0x15   :  { %p373_p9 = pnand %p372_p8, %p366_p5 }
  0x17   :  { %376 = shalt.err (!%p373_p9)
}
  0x18   :  { %22 = dma.hbm_to_vmem [thread:$0]  %s501_s0, 128, %s20_s26, [#allocation3]  }
  0x19   :  { %s385_s7 = scalar_lea.vmem %s43_s28, 2048  ;;  %p390_p11 = scmp.lt.s32.totalorder %s43_s28, %s43_s28 }
  0x1a   :  { %p386_p10 = scmp.ne.s32.totalorder %s43_s28, %s385_s7  ;;  %p391_p12 = scmp.lt.s32.totalorder %s385_s7, %s385_s7 }
  0x1c   :  { %p392_p13 = por %p391_p12, %p390_p11 }
  0x1e   :  { %p393_p0 = pnand %p392_p13, %p386_p10 }
  0x20   :  { %396 = shalt.err (!%p393_p0)
}
  0x21   :  { %48 = dma.hbm_to_vmem [thread:$0]  %s504_s3, 2048, %s43_s28, [#allocation6], %s424_s21, %s424_s21, %s425_s22  }
  0x22   :  { %417 = dma.done.wait [#allocation3], 128  }
  0x23   :  { %418 = vsyncadd [#allocation3], 4294967168 }
  0x24   :  { %419 = dma.done.wait [#allocation6], 2560  }
  0x25   :  { %420 = vsyncadd [#allocation6], 4294964736  ;;  %v428_v0 = vmov 0.0   ;;  %vm429_vm0 = vmmov 0   ;;  %v64_v1 = vld [vmem:[#allocation5 + $0x18] sm:$0xff]  ;;  %v63_v2 = vld [vmem:[#allocation5 + $0x10] sm:$0xff] }
  0x26   :  { %283 = vmatprep.subr.mxu0 %v428_v0  ;;  %291 = vmatprep.mubr.msk.f32.mxu0 %vm429_vm0, %v428_v0  ;;  %v162_v3 = vld [vmem:[#allocation7 + $0x78] sm:$0xff]  ;;  %v62_v4 = vld [vmem:[#allocation5 + $0x8] sm:$0xff]  ;;  %v161_v5 = vld [vmem:[#allocation7 + $0x70] sm:$0xff]  ;;  %vm72_vm1 = vcmask 261120   ;;  %s430_s11 = smov [#allocation8]  }
  0x27   :  { %294 = vmatprep.subr.mxu1 %v428_v0  ;;  %326 = vmatprep.mubr.msk.f32.mxu1 %vm429_vm0, %v428_v0  ;;  %v160_v6 = vld [vmem:[#allocation7 + $0x68] sm:$0xff]  ;;  %v61_v7 = vld [vmem:[#allocation5] sm:$0xff]  ;;  %v60_v8 = vld [vmem:[#allocation2] sm:$0xff]  ;;  %s248_s12 = sshll.u32 %s430_s11, 4  ;;  %s249_s12 = int_to_ptr.vmem [resolvable:$true] %s248_s12 }
  0x28   :  { %284 = vmatpush3.msra.mxu0 %v64_v1  ;;  %295 = vmatpush3.msra.mxu1 %v162_v3  ;;  %v159_v9 = vld [vmem:[#allocation7 + $0x60] sm:$0xff]  ;;  %v158_v10 = vld [vmem:[#allocation7 + $0x58] sm:$0xff]  ;;  %v157_v11 = vld [vmem:[#allocation7 + $0x50] sm:$0xff]  ;;  %s397_s13 = scalar_lea.vmem %s249_s12, 128  ;;  %p402_p2 = scmp.lt.s32.totalorder %s249_s12, %s249_s12 }
  0x29   :  { %285 = vmatprep.subr.mxu0 %v428_v0  ;;  %296 = vmatprep.subr.mxu1 %v428_v0  ;;  %v156_v12 = vld [vmem:[#allocation7 + $0x48] sm:$0xff]  ;;  %v155_v13 = vld [vmem:[#allocation7 + $0x40] sm:$0xff]  ;;  %v154_v14 = vld [vmem:[#allocation7 + $0x38] sm:$0xff]  ;;  %p398_p1 = scmp.ne.s32.totalorder %s249_s12, %s397_s13  ;;  %p403_p3 = scmp.lt.s32.totalorder %s397_s13, %s397_s13 }
  0x2a   :  { %286 = vmatpush3.msra.mxu0 %v63_v2  ;;  %297 = vmatpush3.msra.mxu1 %v161_v5  ;;  %v153_v15 = vld [vmem:[#allocation7 + $0x30] sm:$0xff]  ;;  %v152_v16 = vld [vmem:[#allocation7 + $0x28] sm:$0xff]  ;;  %v151_v17 = vld [vmem:[#allocation7 + $0x20] sm:$0xff] }
  0x2b   :  { %287 = vmatprep.subr.mxu0 %v428_v0  ;;  %298 = vmatprep.subr.mxu1 %v428_v0  ;;  %v150_v18 = vld [vmem:[#allocation7 + $0x18] sm:$0xff]  ;;  %v149_v19 = vld [vmem:[#allocation7 + $0x10] sm:$0xff]  ;;  %v148_v20 = vld [vmem:[#allocation7 + $0x8] sm:$0xff]  ;;  %p404_p4 = por %p403_p3, %p402_p2 }
  0x2c   :  { %288 = vmatpush3.msra.mxu0 %v62_v4  ;;  %299 = vmatpush3.msra.mxu1 %v160_v6  ;;  %v147_v21 = vld [vmem:[#allocation7] sm:$0xff]  ;;  %v258_v22 = vld [vmem:[%s503_s2] ss:$0 sm:$0xff] }
  0x2d   :  { %289 = vmatprep.subr.mxu0 %v428_v0  ;;  %300 = vmatprep.subr.mxu1 %v428_v0  ;;  %v260_v27 = vld [vmem:[%s505_s4] ss:$0 sm:$0xff]  ;;  %p405_p5 = pnand %p404_p4, %p398_p1 }
  0x2e   :  { %290 = vmatpush3.msra.mxu0 %v61_v7  ;;  %301 = vmatpush3.msra.mxu1 %v159_v9 }
  0x2f   :  { %292 = vmatmul.mubr.msk.f32.vlgmr.msra.gmra.mxu0 %vm72_vm1, %v60_v8  ;;  %302 = vmatprep.subr.mxu1 %v428_v0 }
  0x30   :  { %303 = vmatpush3.msra.mxu1 %v158_v10 }
  0x31   :  { %304 = vmatprep.subr.mxu1 %v428_v0 }
  0x32   :  { %305 = vmatpush3.msra.mxu1 %v157_v11 }
  0x33   :  { %306 = vmatprep.subr.mxu1 %v428_v0 }
  0x34   :  { %307 = vmatpush3.msra.mxu1 %v156_v12 }
  0x35   :  { %308 = vmatprep.subr.mxu1 %v428_v0 }
  0x36   :  { %309 = vmatpush3.msra.mxu1 %v155_v13 }
  0x37   :  { %310 = vmatprep.subr.mxu1 %v428_v0 }
  0x38   :  { %311 = vmatpush3.msra.mxu1 %v154_v14 }
  0x39   :  { %312 = vmatprep.subr.mxu1 %v428_v0 }
  0x3a   :  { %313 = vmatpush3.msra.mxu1 %v153_v15 }
  0x3b   :  { %314 = vmatprep.subr.mxu1 %v428_v0 }
  0x3c   :  { %315 = vmatpush3.msra.mxu1 %v152_v16 }
  0x3d   :  { %316 = vmatprep.subr.mxu1 %v428_v0 }
  0x3e   :  { %317 = vmatpush3.msra.mxu1 %v151_v17 }
  0x3f   :  { %318 = vmatprep.subr.mxu1 %v428_v0 }
  0x40   :  { %319 = vmatpush3.msra.mxu1 %v150_v18 }
  0x41   :  { %320 = vmatprep.subr.mxu1 %v428_v0 }
  0x42   :  { %321 = vmatpush3.msra.mxu1 %v149_v19 }
  0x43   :  { %322 = vmatprep.subr.mxu1 %v428_v0 }
  0x44   :  { %323 = vmatpush3.msra.mxu1 %v148_v20 }
  0x45   :  { %324 = vmatprep.subr.mxu1 %v428_v0 }
  0x46   :  { %325 = vmatpush3.msra.mxu1 %v147_v21 }
  0xef   :  { %v142_v23 = vpop.f32.mrf.mxu0 }
  0xf0   :  { %v143_v24 = vadd.f32 %v258_v22, %v142_v23 }
  0xf1   :  { %v293_v25 = vpop.f32.mrf.mxu0 }
  0xf2   :  { %v146_v26 = vmax.f32 %v143_v24, 0.0 }
  0xf4   :  { %327 = vmatmul.mubr.f32.vlgmr.msra.gmra.mxu1 %v146_v26 }
 0x1b4   :  { %v236_v28 = vpop.f32.mrf.mxu1 }
 0x1b5   :  { %v237_v29 = vadd.f32 %v260_v27, %v236_v28 }
 0x1b6   :  { %v328_v30 = vpop.f32.mrf.mxu1 }
 0x1b7   :  { %v240_v31 = vmax.f32 %v237_v29, 0.0 }
 0x1b9   :  { %241 = vst [vmem:[#allocation8] sm:$0xff] %v240_v31 }
 0x1ba   :  { %408 = shalt.err (!%p405_p5)
}
 0x1bb   :  { %251 = dma.vmem_to_hbm [thread:$0]  %s249_s12, 128, %s506_s5, [#allocation4]  }
 0x1bc   :  { %421 = dma.done.wait [#allocation4], 128  }
 0x1bd   :  { %422 = vsyncadd [#allocation4], 4294967168 }
 0x1be   :  { %255 = vsyncpa [#allocation3], 1 }
 0x1bf   :  { %256 = vsyncpa [#allocation6], 1 }
 0x1c0   :  { %257 = vsyncpa [#allocation4], 1 }

</bundles_post_ra>
